<compile_context>
chip_gen: v7x
topology: tpu7x:2x2x1
jax: 0.10.0
libtpu: 0.0.40
codegen_flags: <defaults>
</compile_context>

<pallas_src>
import jax
import jax.numpy as jnp
from jax.experimental import pallas as pl
from jax.experimental.pallas import tpu as pltpu


LANE = 512                       # lane-dense slab width (multiple of 128)
TILE_BYTES = 6 * 1024 * 1024     # ~6 MiB/tile; 2 arrays x 2 buffers ~= 24 MiB in flight
VMEM_LIMIT_BYTES = 40 << 20      # clears v5e/v6e scoped defaults, fits v7x's 64 MiB physical
MIN_SPLIT_BYTES = 2 << 20        # above this, force >=2 grid steps (v7x dual-TC split)


def _quadratic_kernel(x_ref, o_ref):
    x = x_ref[...]
    # x * relu(x) == x*x where x > 0 else 0
    o_ref[...] = x * jnp.maximum(x, jnp.zeros((), dtype=x.dtype))


def _round_up(a, b):
    return -(-a // b) * b


def _quadratic_2d(x2d):
    """Run the Pallas kernel over a (rows, LANE) lane-dense slab."""
    rows, lane = x2d.shape
    dtype = x2d.dtype
    itemsize = jnp.dtype(dtype).itemsize

    # dtype-dependent sublane quantum: 8 (f32), 16 (bf16/f16), 32 (int8/fp8)
    sub = 8 * max(1, 4 // itemsize)

    # Largest SUB-aligned tile with ~TILE_BYTES per step (constant bytes
    # across dtypes, so bf16 tiles carry twice the rows of f32 tiles).
    max_tile_rows = max(sub, (TILE_BYTES // (lane * itemsize)) // sub * sub)

    total_bytes = rows * lane * itemsize
    min_steps = 2 if total_bytes >= MIN_SPLIT_BYTES else 1
    steps = max(min_steps, pl.cdiv(rows, max_tile_rows))
    if steps > 1 and steps % 2 == 1:
        steps += 1                      # even split keeps both v7x TCs busy

    if steps == 1:
        tile_rows = rows                # full-extent block: always legal
    else:
        tile_rows = min(max_tile_rows,
                        max(sub, _round_up(pl.cdiv(rows, steps), sub)))

    grid = (pl.cdiv(rows, tile_rows),)

    cost = pl.CostEstimate(
        flops=2 * rows * lane,                       # one max + one mul per element
        transcendentals=0,
        bytes_accessed=2 * rows * lane * itemsize,   # read N + write N
    )

    return pl.pallas_call(
        _quadratic_kernel,
        out_shape=jax.ShapeDtypeStruct((rows, lane), dtype),
        grid=grid,
        in_specs=[pl.BlockSpec((tile_rows, lane), lambda i: (i, 0))],
        out_specs=pl.BlockSpec((tile_rows, lane), lambda i: (i, 0)),
        compiler_params=pltpu.CompilerParams(
            dimension_semantics=("parallel",),
            vmem_limit_bytes=VMEM_LIMIT_BYTES,
        ),
        cost_estimate=cost,
    )(x2d)


def quadratic(x):
    """y = x * relu(x), elementwise, any shape/dtype."""
    orig_shape = x.shape
    n = x.size
    if n == 0:
        return x

    x_flat = jnp.reshape(x, (-1,))

    if n % LANE == 0:
        # Fast path (typical NN shapes): zero extra copies, no padding.
        out2d = _quadratic_2d(jnp.reshape(x_flat, (n // LANE, LANE)))
        return jnp.reshape(out2d, orig_shape)

    # Ragged tail: kernel handles the lane-aligned bulk; the (< LANE element)
    # remainder is a plain fused XLA expression.  This avoids the previous
    # full-array zero-pad copy; only the final concatenate rewrites the output.
    n_bulk = (n // LANE) * LANE
    tail = x_flat[n_bulk:]
    tail_out = tail * jnp.maximum(tail, jnp.zeros((), dtype=x.dtype))
    if n_bulk == 0:
        return jnp.reshape(tail_out, orig_shape)
    bulk2d = jnp.reshape(x_flat[:n_bulk], (n_bulk // LANE, LANE))
    bulk_out = jnp.reshape(_quadratic_2d(bulk2d), (-1,))
    return jnp.reshape(jnp.concatenate([bulk_out, tail_out]), orig_shape)


if __name__ == "__main__":
    key = jax.random.PRNGKey(0)

    # Small NCHW-style input consistent with the (shape-agnostic) module.
    x = jax.random.normal(key, (2, 4, 16, 16), dtype=jnp.float32)
    y = jax.block_until_ready(quadratic(x))
    y_ref = x * jnp.maximum(x, 0.0)
    assert y.shape == x.shape and y.dtype == x.dtype
    assert jnp.allclose(y, y_ref, atol=1e-6, rtol=1e-6)

    # Ragged shape to exercise the bulk-kernel + XLA-tail path.
    x2 = jax.random.normal(jax.random.PRNGKey(1), (3, 5, 7, 11),
                           dtype=jnp.float32)
    y2 = jax.block_until_ready(quadratic(x2))
    y2_ref = x2 * jnp.maximum(x2, 0.0)
    assert y2.shape == x2.shape and y2.dtype == x2.dtype
    assert jnp.allclose(y2, y2_ref, atol=1e-6, rtol=1e-6)

    # bf16 input to exercise the dtype-scaled (sublane quantum 16) tiling.
    x3 = jax.random.normal(jax.random.PRNGKey(2), (2, 4, 16, 16),
                           dtype=jnp.bfloat16)
    y3 = jax.block_until_ready(quadratic(x3))
    y3_ref = x3 * jnp.maximum(x3, jnp.zeros((), dtype=jnp.bfloat16))
    assert y3.shape == x3.shape and y3.dtype == x3.dtype
    assert jnp.allclose(y3.astype(jnp.float32), y3_ref.astype(jnp.float32),
                        atol=1e-2, rtol=1e-2)

    print("KERNEL_OK")
</pallas_src>

<mosaic_0001>
module attributes {stable_mosaic.version = 11 : i64} {
  func.func @_quadratic_kernel(%arg0: i32, %arg1: memref<4x512xf32, #tpu.memory_space<vmem>>, %arg2: memref<4x512xf32, #tpu.memory_space<vmem>>) attributes {dimension_semantics = [#tpu.dimension_semantics<parallel>], iteration_bounds = array<i64: 1>, scalar_prefetch = 0 : i64, scratch_operands = 0 : i64, tpu.core_type = #tpu.core_type<tc>, window_params = [{transform_indices = @transform_0, window_bounds = array<i64: 4, 512>}, {transform_indices = @transform_1, window_bounds = array<i64: 4, 512>}]} {
    %c0 = arith.constant 0 : index
    %c0_0 = arith.constant 0 : index
    %0 = vector.load %arg1[%c0, %c0_0] : memref<4x512xf32, #tpu.memory_space<vmem>>, vector<4x512xf32>
    %cst = arith.constant 0.000000e+00 : f32
    %1 = vector.broadcast %cst : f32 to vector<4x512xf32>
    %2 = arith.maximumf %0, %1 : vector<4x512xf32>
    %3 = arith.mulf %0, %2 : vector<4x512xf32>
    %c0_1 = arith.constant 0 : index
    %c0_2 = arith.constant 0 : index
    %4 = vector.load %arg2[%c0_1, %c0_2] : memref<4x512xf32, #tpu.memory_space<vmem>>, vector<4x512xf32>
    tpu.vector_store %arg2[%c0_1, %c0_2], %3 {strides = array<i32>} : memref<4x512xf32, #tpu.memory_space<vmem>>, vector<4x512xf32>,
    return
  }
  func.func @transform_0(%arg0: i32) -> (i32, i32) {
    %c0_i32 = arith.constant 0 : i32
    %c0_i32_0 = arith.constant 0 : i32
    return %arg0, %c0_i32 : i32, i32
  }
  func.func @transform_1(%arg0: i32) -> (i32, i32) {
    %c0_i32 = arith.constant 0 : i32
    %c0_i32_0 = arith.constant 0 : i32
    return %arg0, %c0_i32 : i32, i32
  }
}

</mosaic_0001>

<bundles_post_ra>
// kernel: tpu_custom_call.1
= control target key start
LH: loop header
LB: loop body
LE: loop exit
PB: predicated region body
PF: predicated region fallthrough
CT: control target
= control target key end

     0   :  { %6 = vsyncpa [#allocation3], 0  ;;  %s130_s0 = inlined_call_operand.hbm [shape: f32[4,512], index: 0, kind: input, shape index: {}]   ;;  %s131_s1 = inlined_call_operand.hbm [shape: f32[4,512], index: 1, kind: output, shape index: {}]  }
   0x1   :  { %7 = vsyncpa [#allocation4], 0  ;;  %s94_s6 = smov [#allocation2]   ;;  %s46_s10 = scalar_lea.hbm %s130_s0, 256 }
   0x2   :  { %s14_s7 = sshll.u32 %s94_s6, 4  ;;  %p47_p0 = scmp.ne.s32.totalorder %s130_s0, %s46_s10  ;;  %s15_s7 = int_to_ptr.vmem [resolvable:$true] %s14_s7 }
   0x3   :  { %p50_p1 = scmp.lt.u32.totalorder %s46_s10, %s130_s0 }
   0x5   :  { %p52_p2 = pnand %p50_p1, %p47_p0 }
   0x7   :  { %55 = shalt.err (!%p52_p2)
}
   0x8   :  { %s56_s15 = scalar_lea.vmem %s15_s7, 256  ;;  %p61_p4 = scmp.lt.s32.totalorder %s15_s7, %s15_s7 }
   0x9   :  { %p57_p3 = scmp.ne.s32.totalorder %s15_s7, %s56_s15  ;;  %p62_p5 = scmp.lt.s32.totalorder %s56_s15, %s56_s15 }
   0xb   :  { %p63_p6 = por %p62_p5, %p61_p4 }
   0xd   :  { %p64_p7 = pnand %p63_p6, %p57_p3 }
   0xf   :  { %67 = shalt.err (!%p64_p7)
}
  0x10   :  { %17 = dma.hbm_to_vmem [thread:$0]  %s130_s0, 256, %s15_s7, [#allocation3]  }
  0x11   :  { %90 = dma.done.wait [#allocation3], 256  }
  0x12   :  { %91 = vsyncadd [#allocation3], 4294967040  ;;  %v21_v0 = vld [vmem:[#allocation2] sm:$0xff]  ;;  %v22_v1 = vld [vmem:[#allocation2 + $0x8] sm:$0xff]  ;;  %s95_s18 = smov [#allocation5]  }
  0x13   :  { %s35_s19 = sshll.u32 %s95_s18, 4  ;;  %v23_v2 = vmax.f32 %v21_v0, 0.0  ;;  %v24_v3 = vmax.f32 %v22_v1, 0.0  ;;  %s36_s19 = int_to_ptr.vmem [resolvable:$true] %s35_s19 }
  0x14   :  { %s68_s20 = scalar_lea.vmem %s36_s19, 256  ;;  %p73_p9 = scmp.lt.s32.totalorder %s36_s19, %s36_s19 }
  0x15   :  { %v25_v4 = vmul.f32 %v23_v2, %v21_v0  ;;  %v26_v5 = vmul.f32 %v24_v3, %v22_v1  ;;  %p69_p8 = scmp.ne.s32.totalorder %s36_s19, %s68_s20  ;;  %p74_p10 = scmp.lt.s32.totalorder %s68_s20, %s68_s20 }
  0x17   :  { %27 = vst [vmem:[#allocation5] sm:$0xff] %v25_v4  ;;  %28 = vst [vmem:[#allocation5 + $0x8] sm:$0xff] %v26_v5  ;;  %p75_p11 = por %p74_p10, %p73_p9 }
  0x19   :  { %p76_p12 = pnand %p75_p11, %p69_p8 }
  0x1b   :  { %79 = shalt.err (!%p76_p12)
}
  0x1c   :  { %s80_s22 = scalar_lea.hbm %s131_s1, 256 }
  0x1d   :  { %p81_p13 = scmp.ne.s32.totalorder %s131_s1, %s80_s22  ;;  %p84_p0 = scmp.lt.u32.totalorder %s80_s22, %s131_s1 }
  0x1f   :  { %p86_p1 = pnand %p84_p0, %p81_p13 }
  0x21   :  { %89 = shalt.err (!%p86_p1)
}
  0x22   :  { %38 = dma.vmem_to_hbm [thread:$0]  %s36_s19, 256, %s131_s1, [#allocation4]  }
  0x23   :  { %92 = dma.done.wait [#allocation4], 256  }
  0x24   :  { %93 = vsyncadd [#allocation4], 4294967040 }
  0x25   :  { %42 = vsyncpa [#allocation3], 1 }
  0x26   :  { %43 = vsyncpa [#allocation4], 1 }

</bundles_post_ra>
